<compile_context>
chip_gen: v6e
topology: v6e:2x2x1
jax: 0.10.0
libtpu: 0.0.40
codegen_flags: <defaults>
</compile_context>

<pallas_src>
import jax
import jax.numpy as jnp
from jax.experimental import pallas as pl
from jax.experimental.pallas import tpu as pltpu

NUM_CLASSES = 16  # stand-in for settings.NUM_CLASSES (synthetic)


def _round_up(x, m):
    return (x + m - 1) // m * m


def _cdiv(a, b):
    return -(-a // b)


# ----------------------------------------------------------------------------
# Pallas kernel: tiled (M,K)x(K,N) matmul + bias (+ReLU).
# bf16 operands, f32 MXU accumulation, bf16 output.  Used for every conv.
# ----------------------------------------------------------------------------
def _matmul_bias_act(a, w, bias_row, *, relu=True, out_dtype=jnp.bfloat16,
                     m_tiles=2):
    m, k = a.shape
    kw_, n_pad = w.shape
    assert kw_ == k and n_pad % 128 == 0
    # 2 M tiles per layer: both v7x TensorCores get work, per-step overhead is
    # minimal on v5e/v6e.  Boundary (partial) M blocks are masked by Pallas.
    tm = _round_up(_cdiv(m, m_tiles), 16)          # bf16 sublane packing: 16
    grid_m = _cdiv(m, tm)

    def kernel(a_ref, w_ref, b_ref, o_ref):
        acc = jnp.dot(a_ref[...], w_ref[...], preferred_element_type=jnp.float32)
        acc = acc + b_ref[...]
        if relu:
            acc = jnp.maximum(acc, 0.0)
        o_ref[...] = acc.astype(o_ref.dtype)

    return pl.pallas_call(
        kernel,
        out_shape=jax.ShapeDtypeStruct((m, n_pad), out_dtype),
        grid=(grid_m,),
        in_specs=[
            pl.BlockSpec((tm, k), lambda i: (i, 0)),       # K = full dim
            pl.BlockSpec((k, n_pad), lambda i: (0, 0)),    # weights resident
            pl.BlockSpec((1, n_pad), lambda i: (0, 0)),
        ],
        out_specs=pl.BlockSpec((tm, n_pad), lambda i: (i, 0)),
        compiler_params=pltpu.CompilerParams(
            dimension_semantics=("parallel",),
            vmem_limit_bytes=32 * 1024 * 1024),
    )(a, w, bias_row)


# ----------------------------------------------------------------------------
# Convolution = NHWC patch extraction (XLA) + Pallas matmul kernel.
# Groups are folded into the (block-diagonal) packed weight, so the patches
# tensor is consumed untouched.
# ----------------------------------------------------------------------------
def conv2d_nhwc(x, w_packed, bias_row, *, ksize, stride, padding, relu=True,
                out_dtype=jnp.bfloat16):
    n, h, wd, cin = x.shape
    kh, kw = ksize
    k_total, n_pad = w_packed.shape
    assert k_total == cin * kh * kw
    oh = (h + 2 * padding - kh) // stride + 1
    ow = (wd + 2 * padding - kw) // stride + 1

    # Feature dim is channel-major (c, kh, kw), matching flattened OIHW weights
    # (verified against lax.conv_general_dilated in the self-check below).
    patches = jax.lax.conv_general_dilated_patches(
        x.astype(jnp.bfloat16), (kh, kw), (stride, stride),
        padding=[(padding, padding), (padding, padding)],
        dimension_numbers=("NHWC", "HWIO", "NHWC"))        # (n, oh, ow, cin*kh*kw)
    cols = patches.reshape(n * oh * ow, k_total)           # free reshape (NHWC)

    out = _matmul_bias_act(cols, w_packed, bias_row, relu=relu,
                           out_dtype=out_dtype)
    return out.reshape(n, oh, ow, n_pad)                   # channels padded to n_pad


# ----------------------------------------------------------------------------
# MaxPool2d(kernel=3, stride=2) in NHWC via a single fused reduce_window.
# ----------------------------------------------------------------------------
def maxpool_3x3_s2(x):
    return jax.lax.reduce_window(
        x, jnp.array(-jnp.inf, x.dtype), jax.lax.max,
        window_dimensions=(1, 3, 3, 1), window_strides=(1, 2, 2, 1),
        padding="VALID")


# ----------------------------------------------------------------------------
# Pallas kernel: cross-channel LRN  x / (1 + alpha/size * sum_{|dc|<=2} x^2)^beta
# (matches LRN(local_size=5) with AvgPool3d / count_include_pad semantics).
# NHWC: channels are lanes, so the 5-term band sum is 4 masked lane rolls.
# ----------------------------------------------------------------------------
def lrn_nhwc(x, *, size=5, alpha=1e-4, beta=0.75, n_tiles=2):
    n, h, w, c = x.shape
    p = n * h * w
    c_pad = _round_up(c, 128)
    tp = _round_up(_cdiv(p, n_tiles), 16)
    p_pad = tp * n_tiles
    xf = jnp.pad(x.reshape(p, c), ((0, p_pad - p), (0, c_pad - c)))

    half = (size - 1) // 2
    scale = alpha / size

    def kernel(x_ref, o_ref):
        v = x_ref[...].astype(jnp.float32)
        v2 = v * v
        col = jax.lax.broadcasted_iota(jnp.int32, v2.shape, 1)
        s = v2
        for d in range(1, half + 1):
            # x[c-d]^2 term: positive lane roll, mask the circular wrap at c<d
            s = s + jnp.where(col >= d, pltpu.roll(v2, d, axis=1), 0.0)
            # x[c+d]^2 term: roll by (c_pad-d), mask channels past c-1-d
            s = s + jnp.where(col < c - d, pltpu.roll(v2, c_pad - d, axis=1), 0.0)
        base = 1.0 + scale * s                       # >= 1
        r = jax.lax.rsqrt(base)                      # base^-1/2
        inv_div = r * jnp.sqrt(r)                    # base^-3/4 (beta = 0.75)
        o_ref[...] = (v * inv_div).astype(o_ref.dtype)

    out = pl.pallas_call(
        kernel,
        out_shape=jax.ShapeDtypeStruct((p_pad, c_pad), x.dtype),
        grid=(n_tiles,),
        in_specs=[pl.BlockSpec((tp, c_pad), lambda i: (i, 0))],
        out_specs=pl.BlockSpec((tp, c_pad), lambda i: (i, 0)),
        compiler_params=pltpu.CompilerParams(dimension_semantics=("parallel",)),
    )(xf)
    return out[:p, :c].reshape(n, h, w, c)


# ----------------------------------------------------------------------------
# Pallas kernel: fused CAM head = AvgPool2d(13) (global spatial mean on the
# 13x13 map) -> FCView -> Linear(1024, NUM_CLASSES) -> Softmax(dim=1).
# x comes in channels-last so c=1024 is the lane dim; classes padded to 128.
# ----------------------------------------------------------------------------
def cam_head(x, w_pad, bias_row, num_classes):
    n, h, wd, c = x.shape            # h = wd = 13: the only size compatible
    hw = h * wd                      # with AvgPool(13) + Linear(1024)
    xf = x.reshape(n, hw, c)
    nc_pad = w_pad.shape[1]
    inv_hw = 1.0 / hw

    def kernel(x_ref, w_ref, b_ref, o_ref):
        feat = jnp.sum(x_ref[...].astype(jnp.float32), axis=1) * inv_hw  # (n, c)
        logits = jnp.dot(feat.astype(jnp.bfloat16), w_ref[...],
                         preferred_element_type=jnp.float32) + b_ref[...]
        colid = jax.lax.broadcasted_iota(jnp.int32, logits.shape, 1)
        logits = jnp.where(colid < num_classes, logits, -jnp.inf)
        mx = jnp.max(logits, axis=-1, keepdims=True)
        e = jnp.exp(logits - mx)
        o_ref[...] = e / jnp.sum(e, axis=-1, keepdims=True)

    out = pl.pallas_call(
        kernel,
        out_shape=jax.ShapeDtypeStruct((n, nc_pad), jnp.float32),
    )(xf, w_pad, bias_row)
    return out[:, :num_classes]


# ----------------------------------------------------------------------------
# Parameters (deterministic, PyTorch-default-style uniform init) + packing.
# ----------------------------------------------------------------------------
def init_params(key):
    def conv_init(k, cout, cin_g, kh, kw):
        k1, k2 = jax.random.split(k)
        bound = 1.0 / (cin_g * kh * kw) ** 0.5
        w = jax.random.uniform(k1, (cout, cin_g, kh, kw), jnp.float32, -bound, bound)
        b = jax.random.uniform(k2, (cout,), jnp.float32, -bound, bound)
        return w, b

    keys = jax.random.split(key, 7)
    params = {
        "conv1": conv_init(keys[0], 96, 3, 11, 11),
        "conv2": conv_init(keys[1], 256, 48, 5, 5),      # groups=2
        "conv3": conv_init(keys[2], 384, 256, 3, 3),
        "conv4": conv_init(keys[3], 384, 192, 3, 3),     # groups=2
        "conv5": conv_init(keys[4], 256, 192, 3, 3),     # groups=2
        "cam_conv": conv_init(keys[5], 1024, 128, 3, 3),  # groups=2
    }
    k1, k2 = jax.random.split(keys[6])
    bound = 1.0 / 1024 ** 0.5
    params["fc_w"] = jax.random.uniform(k1, (NUM_CLASSES, 1024), jnp.float32, -bound, bound)
    params["fc_b"] = jax.random.uniform(k2, (NUM_CLASSES,), jnp.float32, -bound, bound)
    return params


def _pack_conv(w, b, groups):
    """PyTorch OIHW (grouped) conv -> block-diagonal bf16 matmul weight whose K
    ordering matches the channel-major (c, kh, kw) patch features, plus an
    f32 bias row padded to a 128 multiple."""
    cout, cin_g, kh, kw = map(int, w.shape)
    cout_g = cout // groups
    p_k = cin_g * kh * kw
    n_pad = _round_up(cout, 128)
    wt = jnp.transpose(w.reshape(groups, cout_g, p_k), (0, 2, 1))  # (G, p_k, cout_g)
    w_bd = jnp.zeros((groups * p_k, n_pad), jnp.float32)
    for g in range(groups):
        w_bd = w_bd.at[g * p_k:(g + 1) * p_k,
                       g * cout_g:(g + 1) * cout_g].set(wt[g])
    b_row = jnp.zeros((1, n_pad), jnp.float32).at[0, :cout].set(b)
    return w_bd.astype(jnp.bfloat16), b_row


def pack_params(params):
    """One-time inference-weight packing (kept outside the jitted forward)."""
    packed = {}
    for name, groups in (("conv1", 1), ("conv2", 2), ("conv3", 1),
                         ("conv4", 2), ("conv5", 2), ("cam_conv", 2)):
        w, b = params[name]
        packed[name] = _pack_conv(w, b, groups)
    nc_pad = _round_up(NUM_CLASSES, 128)
    fc_w = jnp.zeros((1024, nc_pad), jnp.float32).at[:, :NUM_CLASSES].set(params["fc_w"].T)
    fc_b = jnp.zeros((1, nc_pad), jnp.float32).at[0, :NUM_CLASSES].set(params["fc_b"])
    packed["fc"] = (fc_w.astype(jnp.bfloat16), fc_b)
    return packed


# ----------------------------------------------------------------------------
# Full forward pass (mirrors CaffeNetCAM.forward); NCHW in, (N, classes) out.
# ----------------------------------------------------------------------------
def caffenet_cam_forward(packed, x_nchw):
    x = jnp.transpose(x_nchw, (0, 2, 3, 1)).astype(jnp.bfloat16)   # NHWC bf16

    w, b = packed["conv1"]
    x = conv2d_nhwc(x, w, b, ksize=(11, 11), stride=4, padding=0)[..., :96]
    x = lrn_nhwc(maxpool_3x3_s2(x))

    w, b = packed["conv2"]
    x = conv2d_nhwc(x, w, b, ksize=(5, 5), stride=1, padding=2)
    x = lrn_nhwc(maxpool_3x3_s2(x))

    w, b = packed["conv3"]
    x = conv2d_nhwc(x, w, b, ksize=(3, 3), stride=1, padding=1)
    w, b = packed["conv4"]
    x = conv2d_nhwc(x, w, b, ksize=(3, 3), stride=1, padding=1)
    w, b = packed["conv5"]
    x = conv2d_nhwc(x, w, b, ksize=(3, 3), stride=1, padding=1)
    w, b = packed["cam_conv"]
    x = conv2d_nhwc(x, w, b, ksize=(3, 3), stride=1, padding=1)

    fw, fb = packed["fc"]
    return cam_head(x, fw, fb, NUM_CLASSES)


# ----------------------------------------------------------------------------
# Cheap correctness self-check: grouped conv (patch ordering + block-diagonal
# weight packing) against lax.conv_general_dilated on a tiny case.
# ----------------------------------------------------------------------------
def _self_check_grouped_conv():
    key = jax.random.PRNGKey(42)
    k1, k2, k3 = jax.random.split(key, 3)
    x = jax.random.normal(k1, (1, 7, 7, 8), jnp.float32)
    w = jax.random.normal(k2, (4, 4, 3, 3), jnp.float32) * 0.1   # OIHW, groups=2
    b = jax.random.normal(k3, (4,), jnp.float32) * 0.1
    wp, bp = _pack_conv(w, b, groups=2)
    got = conv2d_nhwc(x, wp, bp, ksize=(3, 3), stride=1,
                      padding=1)[..., :4].astype(jnp.float32)
    ref = jax.lax.conv_general_dilated(
        x.astype(jnp.bfloat16),
        jnp.transpose(w, (2, 3, 1, 0)).astype(jnp.bfloat16),
        window_strides=(1, 1), padding=[(1, 1), (1, 1)],
        dimension_numbers=("NHWC", "HWIO", "NHWC"), feature_group_count=2,
        preferred_element_type=jnp.float32)
    ref = jnp.maximum(ref + b.reshape(1, 1, 1, 4), 0.0)
    assert bool(jnp.allclose(got, ref, rtol=5e-2, atol=5e-2)), "grouped conv mismatch"


if __name__ == "__main__":
    _self_check_grouped_conv()

    key = jax.random.PRNGKey(0)
    kp, kx = jax.random.split(key)
    params = init_params(kp)
    packed = pack_params(params)
    # 227x227 is the smallest input compatible with CAM_pool(13) + Linear(1024)
    # (conv5/CAM feature map must be 13x13); batch kept small (2).
    x = jax.random.normal(kx, (2, 3, 227, 227), jnp.float32)
    fwd = jax.jit(caffenet_cam_forward)
    out = jax.block_until_ready(fwd(packed, x))
    assert out.shape == (2, NUM_CLASSES)
    assert bool(jnp.all(jnp.isfinite(out)))
    print("KERNEL_OK")
</pallas_src>

<mosaic_0001>
module attributes {stable_mosaic.version = 11 : i64} {
  func.func @kernel(%arg0: i32, %arg1: memref<32x72xbf16, #tpu.memory_space<vmem>>, %arg2: memref<72x128xbf16, #tpu.memory_space<vmem>>, %arg3: memref<1x128xf32, #tpu.memory_space<vmem>>, %arg4: memref<32x128xbf16, #tpu.memory_space<vmem>>) attributes {dimension_semantics = [#tpu.dimension_semantics<parallel>], iteration_bounds = array<i64: 2>, scalar_prefetch = 0 : i64, scratch_operands = 0 : i64, tpu.core_type = #tpu.core_type<tc>, window_params = [{transform_indices = @transform_0, window_bounds = array<i64: 32, 72>}, {pipeline_mode = #tpu.pipeline_mode<synchronous>, transform_indices = @transform_1, window_bounds = array<i64: 72, 128>}, {pipeline_mode = #tpu.pipeline_mode<synchronous>, transform_indices = @transform_2, window_bounds = array<i64: 1, 128>}, {transform_indices = @transform_3, window_bounds = array<i64: 32, 128>}]} {
    %c0 = arith.constant 0 : index
    %c0_0 = arith.constant 0 : index
    %0 = vector.load %arg1[%c0, %c0_0] : memref<32x72xbf16, #tpu.memory_space<vmem>>, vector<32x72xbf16>
    %c0_1 = arith.constant 0 : index
    %c0_2 = arith.constant 0 : index
    %1 = vector.load %arg2[%c0_1, %c0_2] : memref<72x128xbf16, #tpu.memory_space<vmem>>, vector<72x128xbf16>
    %cst = arith.constant dense<0.000000e+00> : vector<32x128xf32>
    %2 = tpu.matmul %0, %1, %cst {dimension_numbers = #tpu.dot_dimension_numbers<[1], [0], [0], [1], [0, 0, 1, 1], [], []>} : vector<32x72xbf16>, vector<72x128xbf16>, vector<32x128xf32> -> vector<32x128xf32>
    %c0_3 = arith.constant 0 : index
    %c0_4 = arith.constant 0 : index
    %3 = vector.load %arg3[%c0_3, %c0_4] : memref<1x128xf32, #tpu.memory_space<vmem>>, vector<1x128xf32>
    %4 = vector.broadcast %3 : vector<1x128xf32> to vector<32x128xf32>
    %5 = arith.addf %2, %4 : vector<32x128xf32>
    %cst_5 = arith.constant 0.000000e+00 : f32
    %6 = vector.broadcast %cst_5 : f32 to vector<32x128xf32>
    %7 = arith.maximumf %5, %6 : vector<32x128xf32>
    %8 = arith.truncf %7 : vector<32x128xf32> to vector<32x128xbf16>
    %c0_6 = arith.constant 0 : index
    %c0_7 = arith.constant 0 : index
    %9 = vector.load %arg4[%c0_6, %c0_7] : memref<32x128xbf16, #tpu.memory_space<vmem>>, vector<32x128xbf16>
    tpu.vector_store %arg4[%c0_6, %c0_7], %8 {strides = array<i32>} : memref<32x128xbf16, #tpu.memory_space<vmem>>, vector<32x128xbf16>,
    return
  }
  func.func @transform_0(%arg0: i32) -> (i32, i32) {
    %c0_i32 = arith.constant 0 : i32
    %c0_i32_0 = arith.constant 0 : i32
    return %arg0, %c0_i32 : i32, i32
  }
  func.func @transform_1(%arg0: i32) -> (i32, i32) {
    %c0_i32 = arith.constant 0 : i32
    %c0_i32_0 = arith.constant 0 : i32
    %c0_i32_1 = arith.constant 0 : i32
    return %c0_i32, %c0_i32_0 : i32, i32
  }
  func.func @transform_2(%arg0: i32) -> (i32, i32) {
    %c0_i32 = arith.constant 0 : i32
    %c0_i32_0 = arith.constant 0 : i32
    %c0_i32_1 = arith.constant 0 : i32
    return %c0_i32, %c0_i32_0 : i32, i32
  }
  func.func @transform_3(%arg0: i32) -> (i32, i32) {
    %c0_i32 = arith.constant 0 : i32
    %c0_i32_0 = arith.constant 0 : i32
    return %arg0, %c0_i32 : i32, i32
  }
}

</mosaic_0001>

<bundles_post_ra>
// kernel: tpu_custom_call.1
= control target key start
LH: loop header
LB: loop body
LE: loop exit
PB: predicated region body
PF: predicated region fallthrough
CT: control target
= control target key end

     0   :  { %8 = vsyncpa [#allocation3], 0  ;;  %s956_s0 = inlined_call_operand.hbm [shape: bf16[49,72], index: 0, kind: input, shape index: {}]   ;;  %s957_s1 = inlined_call_operand.hbm [shape: bf16[72,128], index: 1, kind: input, shape index: {}]   ;;  %s958_s2 = inlined_call_operand.vmem [shape: f32[1,128], index: 2, kind: input, shape index: {}]   ;;  %s959_s3 = inlined_call_operand.hbm [shape: bf16[49,128], index: 3, kind: output, shape index: {}]  }
   0x1   :  { %10 = vsyncpa [#allocation3 + $0x1], 0 }
   0x2   :  { %11 = vsyncpa [#allocation6], 0 }
   0x3   :  { %12 = vsyncpa [#allocation4], 0 }
   0x4   :  { %14 = vsyncpa [#allocation4 + $0x1], 0  ;;  %s756_s12 = smov 0   ;;  %s758_s13 = smov 0  }
   0x5   :  { %s760_s14 = smov 0   ;;  %s762_s15 = smov 0  }
   0x6 LB: > { %s777_s16 = sadd.s32 4294967295, %s725_s15   ;;  %s465_s17 = sadd.s32 4294967294, %s725_s15   ;;  %s725_s15 = sphi %s762_s15, %s974_s15   ;;  %s721_s14 = sphi %s760_s14, %s973_s14   ;;  %s717_s13 = sphi %s758_s13, %s972_s13   ;;  %s713_s12 = sphi %s756_s12, %s971_s12  }
   0x7   : > { %s781_s18 = sadd.s32 1, %s725_s15   ;;  %s27_s19 = sadd.s32 1, %s721_s14 }
   0x8   : > { %s24_s20 = ssub.s32 %s725_s15, %s781_s18  ;;  %p34_p0 = scmp.ne.s32.totalorder %s721_s14, %s717_s13 }
   0x9   : > { %p25_p1 = scmp.eq.s32.totalorder %s24_s20, 0  ;;  %p35_p2 = scmp.eq.s32.totalorder %s725_s15, 0 }
   0xa   : > { %p40_p3 = scmp.ne.s32.totalorder %s717_s13, %s713_s12  ;;  %p41_p4 = scmp.eq.s32.totalorder %s777_s16, 0 }
   0xb   : > { %s793_s21 = scalar_select %p25_p1, %s721_s14, %s27_s19  }
   0xc   : > { %p795_p5 = por %p35_p2, %p34_p0  ;;  %p801_p6 = por %p41_p4, %p40_p3 }
   0xd   : > { %p106_p7 = scmp.eq.s32.totalorder %s777_s16, 1  ;;  %p112_p8 = scmp.eq.s32.totalorder %s465_s17, 1 }
   0xe   : > { %s963_s23 = scalar_select %p801_p6, 1, 0 }
   0xf   : > { %p466_p9 = scmp.ge.s32.totalorder %s725_s15, 1  ;;  %p119_p10 = scmp.lt.s32.totalorder %s725_s15, 3 }
  0x10   : > { %p808_p11 = por %p106_p7, %p34_p0  ;;  %p812_p12 = por %p112_p8, %p40_p3 }
  0x11   : > { %p816_p13 = pnand %p466_p9, %p119_p10  ;;  %s727_s27 = smov [#allocation5]  }
  0x12   : > { %s964_s24 = scalar_select %p808_p11, 1, 0 }
  0x13   : > { %s965_s25 = scalar_select %p812_p12, 1, 0 }
  0x14   : > { %p548_p1 = pneg %p816_p13  ;;  %s131_s28 = sshll.u32 %s727_s27, 4  ;;  %s132_s28 = int_to_ptr.vmem [resolvable:$true] %s131_s28 }
  0x15   : > { %s616_s29 = scalar_lea.vmem %s132_s28, 576  ;;  %p624_p8 = scmp.lt.s32.totalorder %s132_s28, %s132_s28 }
  0x16   : > { %p549_p2 = pnand %p548_p1, %p41_p4  ;;  %p617_p7 = scmp.ne.s32.totalorder %s132_s28, %s616_s29 }
  0x17   : > { %p625_p6 = scmp.lt.s32.totalorder %s616_s29, %s616_s29 }
  0x18   : > { %p607_p0 = pneg %p549_p2 }
  0x19   : > { %p626_p12 = por %p625_p6, %p624_p8 }
  0x1a   : > { %p619_p11 = pnand %p617_p7, %p607_p0 }
  0x1c   : > { %p620_p3 = pneg %p619_p11 }
  0x1e   : > { %p627_p9 = pnand %p626_p12, %p620_p3 }
  0x20   : > { %630 = shalt.err (!%p627_p9)
}
  0x21   : > { %s728_s30 = smov 64   ;;  %s729_s4 = smov 4  }
  0x22   : > { %551 = dma.hbm_to_vmem [thread:$0]  (!%p549_p2), %s957_s1, 576, %s132_s28, [#allocation6], %s728_s30, %s728_s30, %s729_s4  }
  0x23   : > { %p961_p10 = scmp.ge.s32.totalorder %s725_s15, 2 }
  0x25   : > { %144 = sbr.rel (%p961_p10) target bundleno = 74 (0x4a), region = 24 }
  0x2a   : > { %147 = sbr.rel (!%p795_p5) target bundleno = 74 (0x4a), region = 28  ;;  %s148_s7 = sand.u32 (%p795_p5), 1, %s721_s14  }
  0x2b   : > { %s470_s8 = sshll.u32 (%p795_p5), %s725_s15, 2  ;;  %s469_s9 = sshll.u32 (%p795_p5), %s148_s7, 4 }
  0x2c   : > { %s154_s10 = ssub.s32 (%p795_p5), 7, %s470_s8  ;;  %s837_s19 = scalar_lea.sflag (%p795_p5), [#allocation3], %s148_s7 }
  0x2d   : > { %p155_p6 = scmp.lt.s32.totalorder (%p795_p5), %s154_s10, 4  ;;  %s152_s20 = scalar_lea.vmem (%p795_p5), [#allocation2], %s469_s9 }
  0x2f   : > { %s976_s10 = smov (!%p155_p6, %s154_s10), 4 }
  0x30   : > { %s834_s11 = sshll.u32 %s976_s10, 6 }
  0x31   : > { %s159_s17 = ssub.s32 256, %s834_s11 }
  0x32   : > { %160 = vsyncadd %s837_s19, %s159_s17  ;;  %p472_p5 = scmp.ne.s32.totalorder %s834_s11, 0  ;;  %s503_s22 = sshll.u32 %s725_s15, 8 }
  0x33   : > { %s845_s29 = scalar_lea.hbm %s956_s0, %s503_s22  ;;  %s165_s30 = sshll.u32 %s152_s20, 4  ;;  %s847_s30 = int_to_ptr.vmem [resolvable:$true] %s165_s30 }
  0x34   : > { %s631_s4 = scalar_lea.hbm %s845_s29, %s834_s11  ;;  %s635_s7 = scalar_lea.hbm %s956_s0, 448 }
  0x35   : > { %p632_p11 = scmp.ne.s32.totalorder %s845_s29, %s631_s4  ;;  %p636_p2 = scmp.lt.s32.totalorder %s845_s29, %s956_s0 }
  0x36   : > { %p637_p0 = scmp.lt.s32.totalorder %s635_s7, %s631_s4 }
  0x37   : > { %p633_p12 = pnand %p632_p11, %p472_p5 }
  0x38   : > { %p638_p7 = por %p637_p0, %p636_p2 }
  0x39   : > { %p634_p1 = pneg %p633_p12 }
  0x3b   : > { %p639_p3 = pnand %p638_p7, %p634_p1 }
  0x3d   : > { %642 = shalt.err (!%p639_p3)
}
  0x3e   : > { %s643_s10 = scalar_lea.vmem %s847_s30, %s834_s11  ;;  %s730_s17 = smov [#allocation2]  }
  0x3f   : > { %p644_p8 = scmp.ne.s32.totalorder %s847_s30, %s643_s10  ;;  %s647_s20 = sshll.u32 %s730_s17, 4  ;;  %s648_s20 = int_to_ptr.vmem [resolvable:$false] %s647_s20 }
  0x40   : > { %s649_s22 = scalar_lea.vmem %s648_s20, 512  ;;  %p650_p11 = scmp.lt.s32.totalorder %s847_s30, %s648_s20 }
  0x41   : > { %p645_p9 = pnand %p644_p8, %p472_p5  ;;  %p651_p12 = scmp.lt.s32.totalorder %s649_s22, %s643_s10 }
  0x43   : > { %p646_p6 = pneg %p645_p9  ;;  %p652_p10 = por %p651_p12, %p650_p11 }
  0x45   : > { %p653_p2 = pnand %p652_p10, %p646_p6 }
  0x47   : > { %656 = shalt.err (!%p653_p2)
}
  0x48   : > { %s731_s27 = smov 64   ;;  %s732_s28 = smov 4  }
  0x49   : > { %171 = dma.hbm_to_vmem [thread:$0]  (%p472_p5), %s845_s29, %s834_s11, %s847_s30, %s837_s19, %s731_s27, %s731_s27, %s732_s28  }
  0x4a PF: > { %177 = sbr.rel (%p816_p13) target bundleno = 336 (0x150), region = 32  ;;  %s876_s4 = sand.u32 (!%p816_p13), 1, %s717_s13  }
  0x4b   : > { %s477_s5 = sshll.u32 (!%p816_p13), %s876_s4, 4  ;;  %s180_s6 = scalar_lea.sflag (!%p816_p13), [#allocation3], %s876_s4 }
  0x4c   : > { %s183_s7 = scalar_lea.vmem (!%p816_p13), [#allocation2], %s477_s5  ;;  %p967_p10 = scmp.ne.s32.totalorder (!%p816_p13), %s963_s23, 0 }
  0x4f   : > { %700 = dma.done.wait (%p967_p10), %s180_s6, 256  }
  0x50   : > { %702 = vsyncadd (%p967_p10), %s180_s6, 4294967040 }
  0x51   : > { %704 = dma.done.wait (%p41_p4), [#allocation6], 576  }
  0x52   : > { %706 = vsyncadd (%p41_p4), [#allocation6], 4294966720  ;;  %vm285_vm0 = vcmask 1043456   ;;  %v598_v0 = vld [vmem:[#allocation5 + $0x20] ss:$0 sps:$4 sm:$0xff]   ;;  %v599_v1 = vld [vmem:[#allocation5 + $0x18] sm:$0xff]  }
  0x53   : > { %541 = vmatprep.subr.msk.bf16.mxu0 %vm285_vm0, %v598_v0  ;;  %v287_v2 = vsel %vm285_vm0, %v598_v0, 0  ;;  %v600_v3 = vld [vmem:[#allocation5 + $0x10] sm:$0xff]   ;;  %vm278_vm1 = vcmask 588800   ;;  %v601_v5 = vld [vmem:[#allocation5 + $0x8] sm:$0xff]   ;;  %v602_v6 = vld [vmem:[#allocation5] sm:$0xff]   ;;  %s209_s11 = scalar_lea.vmem [#allocation7], %s477_s5 }
  0x54   : > { %528 = vmatpush3.bf16.msra.mxu0 %v287_v2  ;;  %v603_v4 = vld [vmem:[%s183_s7] sm:$0xff]   ;;  %v604_v7 = vld [vmem:[%s183_s7 + $0x8] sm:$0xff]   ;;  %s363_s19 = scalar_lea.sflag [#allocation4], %s876_s4  ;;  %p968_p4 = scmp.ne.s32.totalorder %s964_s24, 0 }
  0x55   : > { %529 = vmatprep.subr.bf16.mxu0 %v599_v1  ;;  %537 = vmatprep.mubr.msk.bf16.mxu0 %vm278_vm1, %v603_v4  ;;  %v480_v9 = vld [vmem:[%s958_s2] ss:$0 sm:$0xff]  ;;  %s495_s29 = sshll.u32 (%p968_p4), %s777_s16, 2 }
  0x56   : > { %s371_s30 = ssub.s32 (%p968_p4), 7, %s495_s29 }
  0x57   : > { %p372_p13 = scmp.lt.s32.totalorder (%p968_p4), %s371_s30, 4 }
  0x58   : > { %530 = vmatpush3.bf16.msra.mxu0 %v599_v1 }
  0x59   : > { %531 = vmatprep.subr.bf16.mxu0 %v600_v3 }
  0x5c   : > { %532 = vmatpush3.bf16.msra.mxu0 %v600_v3 }
  0x5d   : > { %533 = vmatprep.subr.bf16.mxu0 %v601_v5 }
  0x60   : > { %534 = vmatpush3.bf16.msra.mxu0 %v601_v5 }
  0x61   : > { %535 = vmatprep.subr.bf16.mxu0 %v602_v6 }
  0x64   : > { %536 = vmatpush3.bf16.msra.mxu0 %v602_v6 }
  0x67   : > { %538 = vmatmul.mubr.msk.bf16.vlgmr.msra.gmra.mxu0 %vm278_vm1, %v604_v7 }
 0x127   : > { %v539_v8 = vpop.f32.mrf.mxu0 }
 0x128   : > { %v332_v11 = vadd.f32 %v539_v8, %v480_v9 }
 0x129   : > { %v323_v10 = vpop.f32.mrf.mxu0 }
 0x12a   : > { %v324_v13 = vadd.f32 %v480_v9, %v323_v10  ;;  %v340_v16 = vmax.f32 %v332_v11, 0.0 }
 0x12b   : > { %v540_v12 = vpop.f32.mrf.mxu0 }
 0x12c   : > { %v335_v14 = vadd.f32 %v540_v12, %v480_v9  ;;  %v338_v19 = vmax.f32 %v324_v13, 0.0 }
 0x12d   : > { %v326_v15 = vpop.f32.mrf.mxu0 }
 0x12e   : > { %v341_v17 = vmax.f32 %v335_v14, 0.0  ;;  %v327_v18 = vadd.f32 %v480_v9, %v326_v15 }
 0x130   : > { %v517_v20 = vpack.c.bf16 %v341_v17, %v340_v16  ;;  %v339_v21 = vmax.f32 %v327_v18, 0.0  ;;  %369 = sbr.rel (!%p968_p4) target bundleno = 336 (0x150), region = 44 }
 0x132   : > { %519 = vst [vmem:[%s209_s11 + $0x8] sm:$0xff] %v517_v20   ;;  %v512_v22 = vpack.c.bf16 %v339_v21, %v338_v19 }
 0x134   : > { %513 = vst [vmem:[%s209_s11] sm:$0xff] %v512_v22  }
 0x135   : > { %s978_s30 = smov (!%p372_p13, %s371_s30), 4 }
 0x136   : > { %s899_s8 = sshll.u32 %s978_s30, 6 }
 0x137   : > { %s376_s9 = ssub.s32 256, %s899_s8 }
 0x138   : > { %377 = vsyncadd %s363_s19, %s376_s9  ;;  %p497_p5 = scmp.ne.s32.totalorder %s899_s8, 0  ;;  %s508_s10 = sshll.u32 %s777_s16, 8 }
 0x139   : > { %s909_s20 = scalar_lea.hbm %s959_s3, %s508_s10  ;;  %s382_s22 = sshll.u32 %s209_s11, 4  ;;  %s911_s22 = int_to_ptr.vmem [resolvable:$true] %s382_s22 }
 0x13a   : > { %s657_s27 = scalar_lea.vmem %s911_s22, %s899_s8  ;;  %s733_s28 = smov [#allocation7]  }
 0x13b   : > { %p658_p1 = scmp.ne.s32.totalorder %s911_s22, %s657_s27  ;;  %s661_s5 = sshll.u32 %s733_s28, 4  ;;  %s662_s5 = int_to_ptr.vmem [resolvable:$false] %s661_s5 }
 0x13c   : > { %s663_s16 = scalar_lea.vmem %s662_s5, 512  ;;  %p664_p3 = scmp.lt.s32.totalorder %s911_s22, %s662_s5 }
 0x13d   : > { %p659_p0 = pnand %p658_p1, %p497_p5  ;;  %p665_p8 = scmp.lt.s32.totalorder %s663_s16, %s657_s27 }
 0x13f   : > { %p660_p7 = pneg %p659_p0  ;;  %p666_p9 = por %p665_p8, %p664_p3 }
 0x141   : > { %p667_p6 = pnand %p666_p9, %p660_p7 }
 0x143   : > { %670 = shalt.err (!%p667_p6)
}
 0x144   : > { %s671_s6 = scalar_lea.hbm %s909_s20, %s899_s8  ;;  %s675_s26 = scalar_lea.hbm %s959_s3, 448 }
 0x145   : > { %p672_p11 = scmp.ne.s32.totalorder %s909_s20, %s671_s6  ;;  %p676_p10 = scmp.lt.s32.totalorder %s909_s20, %s959_s3 }
 0x146   : > { %p677_p4 = scmp.lt.s32.totalorder %s675_s26, %s671_s6 }
 0x147   : > { %p673_p12 = pnand %p672_p11, %p497_p5 }
 0x148   : > { %p678_p13 = por %p677_p4, %p676_p10 }
 0x149   : > { %p674_p2 = pneg %p673_p12 }
 0x14b   : > { %p679_p1 = pnand %p678_p13, %p674_p2 }
 0x14d   : > { %682 = shalt.err (!%p679_p1)
}
 0x14e   : > { %s734_s30 = smov 64   ;;  %s735_s9 = smov 4  }
 0x14f   : > { %388 = dma.vmem_to_hbm [thread:$0]  (%p497_p5), %s911_s22, %s899_s8, %s909_s20, %s363_s19, %s734_s30, %s734_s30, %s735_s9  }
 0x150 PF: > { %s397_s10 = sand.u32 1, %s713_s12   ;;  %p969_p0 = scmp.ne.s32.totalorder %s965_s25, 0 }
 0x151   : > { %p970_p7 = scmp.ge.s32.totalorder %s725_s15, 2  ;;  %s398_s24 = scalar_lea.sflag [#allocation4], %s397_s10 }
 0x153   : > { %p553_p3 = pnand %p970_p7, %p969_p0 }
 0x155   : > { %p554_p8 = pneg %p553_p3 }
 0x157   : > { %708 = dma.done.wait (%p554_p8), %s398_s24, 256  }
 0x158   : > { %710 = vsyncadd (%p554_p8), %s398_s24, 4294967040  ;;  %p17_p9 = scmp.ge.s32.totalorder %s781_s18, 4   ;;  %s971_s12 = smov %s717_s13 }
 0x159   : > { %s972_s13 = smov %s721_s14  ;;  %s973_s14 = smov %s793_s21 }
 0x15a   : > { %s974_s15 = smov %s781_s18  ;;  %19 = sbr.rel (!%p17_p9) target bundleno = 6 (0x6), region = 81 }
 0x15f   :  { %403 = vsyncpa [#allocation3], 1 }
 0x160   :  { %405 = vsyncpa [#allocation3 + $0x1], 1 }
 0x161   :  { %406 = vsyncpa [#allocation6], 1 }
 0x162   :  { %407 = vsyncpa [#allocation4], 1 }
 0x163   :  { %409 = vsyncpa [#allocation4 + $0x1], 1 }

</bundles_post_ra>
